<compile_context>
chip_gen: v6e
topology: v6e:2x2x1
jax: 0.10.0
libtpu: 0.0.40
codegen_flags: <defaults>
</compile_context>

<pallas_src>
import jax
import jax.numpy as jnp
import numpy as np
from jax.experimental import pallas as pl
from jax.experimental.pallas import tpu as pltpu


def _vmem():
    return pl.BlockSpec(memory_space=pltpu.MemorySpace.VMEM)


def _smem():
    return pl.BlockSpec(memory_space=pltpu.MemorySpace.SMEM)


# ----------------------------------------------------------------------------
# One fused kernel for the whole forward pass.
# ----------------------------------------------------------------------------
def make_fused_kernel(G, N, F, HID, K):
    def kernel(feat_ref, shuf_ref, adj_ref, w_ref, b_ref, wbT_ref, bb_ref,
               H_ref, mu_t_ref,
               h1_ref, logits_ref, q_ref, reg_ref):
        bb = bb_ref[0]                    # bilinear scalar bias (SMEM)
        wbT = wbT_ref[...]                # (HID, HID) = Wb^T
        H = H_ref[...]                    # (N, HID) consensus embedding
        mu_t = mu_t_ref[...]              # (HID, K) cluster centers^T

        h1_list, h2_list = [], []
        for g in range(G):                # static unroll (G is tiny)
            x = feat_ref[g]               # (N, F)   zero-padded features
            s = shuf_ref[g]               # (N, F)   shuffled features
            adj = adj_ref[g]              # (N, N)
            w = w_ref[g]                  # (F, HID) zero-padded weight
            b = b_ref[g]                  # (1, HID)

            # GCN:  h = relu(adj @ (x @ W) + b)
            xw = jnp.dot(x, w, preferred_element_type=jnp.float32)
            h1 = jnp.maximum(
                jnp.dot(adj, xw, preferred_element_type=jnp.float32) + b, 0.0)
            sw = jnp.dot(s, w, preferred_element_type=jnp.float32)
            h2 = jnp.maximum(
                jnp.dot(adj, sw, preferred_element_type=jnp.float32) + b, 0.0)
            h1_ref[g] = h1
            h1_list.append(h1)
            h2_list.append(h2)

            # Discriminator (bilinear), matvec form:
            #   c = sigmoid(mean_n h1[n]);  u = c @ Wb^T;  sc[n] = u . h[n] + bb
            c = jax.nn.sigmoid(jnp.mean(h1, axis=0, keepdims=True))     # (1, HID)
            u = jnp.dot(c, wbT, preferred_element_type=jnp.float32)     # (1, HID)
            sc1 = jnp.dot(u, h1.T, preferred_element_type=jnp.float32)  # (1, N)
            sc2 = jnp.dot(u, h2.T, preferred_element_type=jnp.float32)  # (1, N)
            # lane-dense logits row, built in-kernel
            logits_ref[g] = jnp.concatenate([sc1, sc2], axis=1) + bb    # (1, 2N)

        # reg_loss = sum((H - mean_g h1)^2) - sum((H - mean_g h2)^2)
        inv_g = 1.0 / G
        h1_mean = sum(h1_list) * inv_g
        h2_mean = sum(h2_list) * inv_g
        pos = jnp.sum((H - h1_mean) ** 2, keepdims=True)   # (1, 1)
        neg = jnp.sum((H - h2_mean) ** 2, keepdims=True)
        reg_ref[...] = pos - neg

        # Batched DEC soft assignment for z in {H, h1_0, ..., h1_{G-1}}:
        #   q[n,k] = 1/(1 + ||z_n - mu_k||^2), row-normalized (alpha=1).
        z = jnp.concatenate([H] + h1_list, axis=0)                       # (M, HID)
        cross = jnp.dot(z, mu_t, preferred_element_type=jnp.float32)     # (M, K)
        sq_z = jnp.sum(z * z, axis=1, keepdims=True)                     # (M, 1)
        sq_mu = jnp.sum(mu_t * mu_t, axis=0, keepdims=True)              # (1, K)
        dist2 = jnp.maximum(sq_z - 2.0 * cross + sq_mu, 0.0)
        qv = 1.0 / (1.0 + dist2)
        # q ** ((1 + 1.0) / 2.0) is the identity for alpha = 1.
        q_ref[...] = qv * pl.reciprocal(
            jnp.sum(qv, axis=1, keepdims=True), approx=True)

    return kernel


# ----------------------------------------------------------------------------
# Glue: full `modeler.forward`
# ----------------------------------------------------------------------------
def modeler_forward(params, features, adjs, shufs, nb_graphs):
    G = nb_graphs
    N = adjs[0].shape[0]
    HID = params["disc_w"].shape[0]
    K = params["cluster"].shape[0]
    F = max(f.shape[1] for f in features)
    M = (1 + G) * N

    # zero-pad the per-graph feature dims to a common F (exact: 0-cols x 0-rows).
    feat = jnp.stack([jnp.pad(features[i], ((0, 0), (0, F - features[i].shape[1])))
                      for i in range(G)]).astype(jnp.float32)
    shuf = jnp.stack([jnp.pad(shufs[i], ((0, 0), (0, F - shufs[i].shape[1])))
                      for i in range(G)]).astype(jnp.float32)
    w = jnp.stack([jnp.pad(params["gcn_w"][i],
                           ((0, F - params["gcn_w"][i].shape[0]), (0, 0)))
                   for i in range(G)]).astype(jnp.float32)
    adj = jnp.stack(adjs, axis=0).astype(jnp.float32)            # (G, N, N)
    b = jnp.stack(params["gcn_b"], axis=0).astype(jnp.float32)   # (G, 1, HID)
    wbT = params["disc_w"].T.astype(jnp.float32)                 # (HID, HID)
    bb = params["disc_b"].reshape(-1).astype(jnp.float32)        # (1,) -> SMEM
    H_sq = params["H"][0].astype(jnp.float32)                    # (N, HID)
    mu_t = params["cluster"].T.astype(jnp.float32)               # (HID, K)

    # advisory cost estimate for the XLA scheduler
    flops = (G * 2 * (2 * N * F * HID)        # x@W, shuf@W
             + G * 2 * (2 * N * N * HID)      # adj @ (xW)
             + G * (2 * HID * HID)            # c @ Wb^T
             + G * 2 * (2 * N * HID)          # bilinear matvecs
             + 2 * M * HID * K                # soft-assign cross term
             + 8 * N * HID)                   # reg loss
    transcendentals = G * HID + M
    args = (feat, shuf, adj, w, b, wbT, bb, H_sq, mu_t)
    bytes_accessed = (sum(int(a.size) * 4 for a in args)
                      + 4 * (G * N * HID + G * 2 * N + M * K + 1))

    kernel = make_fused_kernel(G, N, F, HID, K)
    h1_out, logits_out, q_all, reg = pl.pallas_call(
        kernel,
        out_shape=(
            jax.ShapeDtypeStruct((G, N, HID), jnp.float32),     # h1 per graph
            jax.ShapeDtypeStruct((G, 1, 2 * N), jnp.float32),   # logits per graph
            jax.ShapeDtypeStruct((M, K), jnp.float32),          # q for [H, h1_0, h1_1, ...]
            jax.ShapeDtypeStruct((1, 1), jnp.float32),          # reg_loss
        ),
        in_specs=[_vmem()] * 6 + [_smem(), _vmem(), _vmem()],
        out_specs=(_vmem(), _vmem(), _vmem(), _vmem()),
        cost_estimate=pl.CostEstimate(flops=flops,
                                      transcendentals=transcendentals,
                                      bytes_accessed=bytes_accessed),
    )(*args)

    result = {
        "h_each": [h1_out[i][None, :, :] for i in range(G)],   # (1, N, HID) each
        "logits": [logits_out[i] for i in range(G)],           # (1, 2N) each
        "reg_loss": reg[0, 0],                                 # scalar
    }
    q = q_all[:N]
    q_list = [q_all[N * (1 + i): N * (2 + i)] for i in range(G)]
    return result, q, H_sq, q_list


# ----------------------------------------------------------------------------
# Pure numpy (float64) reference for the tolerance check.
# ----------------------------------------------------------------------------
def reference_forward(params, features, adjs, shufs, nb_graphs):
    G = nb_graphs
    H = np.asarray(params["H"], np.float64)[0]
    wb = np.asarray(params["disc_w"], np.float64)
    bb = float(np.asarray(params["disc_b"]).reshape(-1)[0])
    mu = np.asarray(params["cluster"], np.float64)
    h1_list, h2_list, logits_list = [], [], []
    for i in range(G):
        x = np.asarray(features[i], np.float64)
        s = np.asarray(shufs[i], np.float64)
        a = np.asarray(adjs[i], np.float64)
        w = np.asarray(params["gcn_w"][i], np.float64)
        b = np.asarray(params["gcn_b"][i], np.float64)
        h1 = np.maximum(a @ (x @ w) + b, 0.0)
        h2 = np.maximum(a @ (s @ w) + b, 0.0)
        c = 1.0 / (1.0 + np.exp(-h1.mean(axis=0)))
        sc1 = h1 @ wb @ c + bb
        sc2 = h2 @ wb @ c + bb
        logits_list.append(np.concatenate([sc1, sc2])[None, :])
        h1_list.append(h1)
        h2_list.append(h2)
    h1m = sum(h1_list) / G
    h2m = sum(h2_list) / G
    pos = ((H - h1m) ** 2).sum()
    neg = ((H - h2m) ** 2).sum()

    def soft_assign(z):
        d2 = ((z[:, None, :] - mu[None, :, :]) ** 2).sum(-1)
        qv = 1.0 / (1.0 + d2)
        return qv / qv.sum(1, keepdims=True)

    return (h1_list, logits_list, pos - neg, pos, neg,
            soft_assign(H), [soft_assign(h) for h in h1_list])


# ----------------------------------------------------------------------------
# Deterministic parameter init (synthetic, in place of the .pth checkpoint)
# ----------------------------------------------------------------------------
def xavier_normal(key, shape):
    fan_in, fan_out = shape[-2], shape[-1]
    std = (2.0 / (fan_in + fan_out)) ** 0.5
    return std * jax.random.normal(key, shape, dtype=jnp.float32)


if __name__ == "__main__":
    N, HID, K, G = 16, 32, 4, 2          # nb_nodes, hid_units, nb_classes, nb_graphs
    dims = [24, 40]                      # per-graph input feature dims

    key = jax.random.PRNGKey(0)
    keys = jax.random.split(key, 16)

    features = [jax.random.normal(keys[i], (N, dims[i]), jnp.float32) for i in range(G)]
    shufs = [features[i][jax.random.permutation(keys[2 + i], N)] for i in range(G)]

    adjs = []
    for i in range(G):
        a = (jax.random.uniform(keys[4 + i], (N, N)) < 0.3).astype(jnp.float32)
        a = jnp.minimum(a + a.T + jnp.eye(N, dtype=jnp.float32), 1.0)
        a = a / jnp.sum(a, axis=1, keepdims=True)    # row-normalized dense adj
        adjs.append(a)

    params = {
        "gcn_w": [xavier_normal(keys[6 + i], (dims[i], HID)) for i in range(G)],
        "gcn_b": [jnp.zeros((1, HID), jnp.float32) for _ in range(G)],
        "disc_w": xavier_normal(keys[8], (HID, HID)),    # nn.Bilinear(hid, hid, 1) weight
        "disc_b": jnp.zeros((1, 1), jnp.float32),
        "H": xavier_normal(keys[9], (1, N, HID)),        # DMGI consensus embedding
        "cluster": xavier_normal(keys[10], (K, HID)),    # cluster_layer
    }

    result, q, H_sq, q_list = modeler_forward(params, features, adjs, shufs, G)
    jax.block_until_ready((result, q, H_sq, q_list))

    # shape checks
    assert q.shape == (N, K) and H_sq.shape == (N, HID)
    assert len(q_list) == G and all(t.shape == (N, K) for t in q_list)
    assert all(l.shape == (1, 2 * N) for l in result["logits"])
    assert all(h.shape == (1, N, HID) for h in result["h_each"])

    # numerical check against a float64 numpy reference (approx-recip + MXU f32)
    h1_ref, logits_ref, reg_ref, pos_ref, neg_ref, q_ref, q_list_ref = \
        reference_forward(params, features, adjs, shufs, G)
    for i in range(G):
        np.testing.assert_allclose(np.asarray(result["h_each"][i][0]), h1_ref[i],
                                   rtol=2e-2, atol=2e-2)
        np.testing.assert_allclose(np.asarray(result["logits"][i]), logits_ref[i],
                                   rtol=2e-2, atol=2e-2)
        np.testing.assert_allclose(np.asarray(q_list[i]), q_list_ref[i],
                                   rtol=2e-2, atol=5e-3)
    np.testing.assert_allclose(np.asarray(q), q_ref, rtol=2e-2, atol=5e-3)
    reg_k = float(result["reg_loss"])
    assert abs(reg_k - reg_ref) <= 5e-3 * (abs(pos_ref) + abs(neg_ref)) + 1e-2

    print("KERNEL_OK")
</pallas_src>

<mosaic_0001>
module attributes {stable_mosaic.version = 11 : i64} {
  func.func @kernel(%arg0: memref<2x16x40xf32, #tpu.memory_space<vmem>>, %arg1: memref<2x16x40xf32, #tpu.memory_space<vmem>>, %arg2: memref<2x16x16xf32, #tpu.memory_space<vmem>>, %arg3: memref<2x40x32xf32, #tpu.memory_space<vmem>>, %arg4: memref<2x1x32xf32, #tpu.memory_space<vmem>>, %arg5: memref<32x32xf32, #tpu.memory_space<vmem>>, %arg6: memref<1xf32, #tpu.memory_space<smem>>, %arg7: memref<16x32xf32, #tpu.memory_space<vmem>>, %arg8: memref<32x4xf32, #tpu.memory_space<vmem>>, %arg9: memref<2x16x32xf32, #tpu.memory_space<vmem>>, %arg10: memref<2x1x32xf32, #tpu.memory_space<vmem>>, %arg11: memref<48x4xf32, #tpu.memory_space<vmem>>, %arg12: memref<1x1xf32, #tpu.memory_space<vmem>>) attributes {dimension_semantics = [], scalar_prefetch = 0 : i64, scratch_operands = 0 : i64, tpu.core_type = #tpu.core_type<tc>} {
    %c0 = arith.constant 0 : index
    %0 = memref.load %arg6[%c0] : memref<1xf32, #tpu.memory_space<smem>>
    %c0_0 = arith.constant 0 : index
    %c0_1 = arith.constant 0 : index
    %1 = vector.load %arg5[%c0_0, %c0_1] : memref<32x32xf32, #tpu.memory_space<vmem>>, vector<32x32xf32>
    %c0_2 = arith.constant 0 : index
    %c0_3 = arith.constant 0 : index
    %2 = vector.load %arg7[%c0_2, %c0_3] : memref<16x32xf32, #tpu.memory_space<vmem>>, vector<16x32xf32>
    %c0_4 = arith.constant 0 : index
    %c0_5 = arith.constant 0 : index
    %3 = vector.load %arg8[%c0_4, %c0_5] : memref<32x4xf32, #tpu.memory_space<vmem>>, vector<32x4xf32>
    %c0_6 = arith.constant 0 : index
    %c0_7 = arith.constant 0 : index
    %c0_8 = arith.constant 0 : index
    %4 = vector.load %arg0[%c0_6, %c0_7, %c0_8] : memref<2x16x40xf32, #tpu.memory_space<vmem>>, vector<1x16x40xf32>
    %5 = vector.shape_cast %4 : vector<1x16x40xf32> to vector<16x40xf32>
    %c0_9 = arith.constant 0 : index
    %c0_10 = arith.constant 0 : index
    %c0_11 = arith.constant 0 : index
    %6 = vector.load %arg1[%c0_9, %c0_10, %c0_11] : memref<2x16x40xf32, #tpu.memory_space<vmem>>, vector<1x16x40xf32>
    %7 = vector.shape_cast %6 : vector<1x16x40xf32> to vector<16x40xf32>
    %c0_12 = arith.constant 0 : index
    %c0_13 = arith.constant 0 : index
    %c0_14 = arith.constant 0 : index
    %8 = vector.load %arg2[%c0_12, %c0_13, %c0_14] : memref<2x16x16xf32, #tpu.memory_space<vmem>>, vector<1x16x16xf32>
    %9 = vector.shape_cast %8 : vector<1x16x16xf32> to vector<16x16xf32>
    %c0_15 = arith.constant 0 : index
    %c0_16 = arith.constant 0 : index
    %c0_17 = arith.constant 0 : index
    %10 = vector.load %arg3[%c0_15, %c0_16, %c0_17] : memref<2x40x32xf32, #tpu.memory_space<vmem>>, vector<1x40x32xf32>
    %11 = vector.shape_cast %10 : vector<1x40x32xf32> to vector<40x32xf32>
    %c0_18 = arith.constant 0 : index
    %c0_19 = arith.constant 0 : index
    %c0_20 = arith.constant 0 : index
    %12 = vector.load %arg4[%c0_18, %c0_19, %c0_20] : memref<2x1x32xf32, #tpu.memory_space<vmem>>, vector<1x1x32xf32>
    %13 = vector.shape_cast %12 : vector<1x1x32xf32> to vector<1x32xf32>
    %cst = arith.constant dense<0.000000e+00> : vector<16x32xf32>
    %14 = tpu.matmul %5, %11, %cst {dimension_numbers = #tpu.dot_dimension_numbers<[1], [0], [0], [1], [0, 0, 1, 1], [], []>} : vector<16x40xf32>, vector<40x32xf32>, vector<16x32xf32> -> vector<16x32xf32>
    %cst_21 = arith.constant dense<0.000000e+00> : vector<16x32xf32>
    %15 = tpu.matmul %9, %14, %cst_21 {dimension_numbers = #tpu.dot_dimension_numbers<[1], [0], [0], [1], [0, 0, 1, 1], [], []>} : vector<16x16xf32>, vector<16x32xf32>, vector<16x32xf32> -> vector<16x32xf32>
    %16 = vector.broadcast %13 : vector<1x32xf32> to vector<16x32xf32>
    %17 = arith.addf %15, %16 : vector<16x32xf32>
    %cst_22 = arith.constant 0.000000e+00 : f32
    %18 = vector.broadcast %cst_22 : f32 to vector<16x32xf32>
    %19 = arith.maximumf %17, %18 : vector<16x32xf32>
    %cst_23 = arith.constant dense<0.000000e+00> : vector<16x32xf32>
    %20 = tpu.matmul %7, %11, %cst_23 {dimension_numbers = #tpu.dot_dimension_numbers<[1], [0], [0], [1], [0, 0, 1, 1], [], []>} : vector<16x40xf32>, vector<40x32xf32>, vector<16x32xf32> -> vector<16x32xf32>
    %cst_24 = arith.constant dense<0.000000e+00> : vector<16x32xf32>
    %21 = tpu.matmul %9, %20, %cst_24 {dimension_numbers = #tpu.dot_dimension_numbers<[1], [0], [0], [1], [0, 0, 1, 1], [], []>} : vector<16x16xf32>, vector<16x32xf32>, vector<16x32xf32> -> vector<16x32xf32>
    %22 = vector.broadcast %13 : vector<1x32xf32> to vector<16x32xf32>
    %23 = arith.addf %21, %22 : vector<16x32xf32>
    %cst_25 = arith.constant 0.000000e+00 : f32
    %24 = vector.broadcast %cst_25 : f32 to vector<16x32xf32>
    %25 = arith.maximumf %23, %24 : vector<16x32xf32>
    %c0_26 = arith.constant 0 : index
    %c0_27 = arith.constant 0 : index
    %c0_28 = arith.constant 0 : index
    %26 = vector.load %arg9[%c0_26, %c0_27, %c0_28] : memref<2x16x32xf32, #tpu.memory_space<vmem>>, vector<1x16x32xf32>
    %27 = vector.shape_cast %26 : vector<1x16x32xf32> to vector<16x32xf32>
    %28 = vector.shape_cast %19 : vector<16x32xf32> to vector<1x16x32xf32>
    tpu.vector_store %arg9[%c0_26, %c0_27, %c0_28], %28 {strides = array<i32>} : memref<2x16x32xf32, #tpu.memory_space<vmem>>, vector<1x16x32xf32>,
    %cst_29 = arith.constant dense<0.000000e+00> : vector<32xf32>
    %29 = vector.multi_reduction <add>, %19, %cst_29 [0] : vector<16x32xf32> to vector<32xf32>
    %30 = vector.shape_cast %29 : vector<32xf32> to vector<1x32xf32>
    %cst_30 = arith.constant 1.600000e+01 : f32
    %31 = vector.broadcast %cst_30 : f32 to vector<1x32xf32>
    %32 = arith.divf %30, %31 : vector<1x32xf32>
    %33 = arith.negf %32 : vector<1x32xf32>
    %34 = math.exp %33 : vector<1x32xf32>
    %cst_31 = arith.constant 1.000000e+00 : f32
    %35 = vector.broadcast %cst_31 : f32 to vector<1x32xf32>
    %36 = arith.addf %35, %34 : vector<1x32xf32>
    %37 = arith.divf %35, %36 : vector<1x32xf32>
    %cst_32 = arith.constant dense<0.000000e+00> : vector<1x32xf32>
    %38 = tpu.matmul %37, %1, %cst_32 {dimension_numbers = #tpu.dot_dimension_numbers<[1], [0], [0], [1], [0, 0, 1, 1], [], []>} : vector<1x32xf32>, vector<32x32xf32>, vector<1x32xf32> -> vector<1x32xf32>
    %39 = tpu.transpose %19, [1, 0] : vector<16x32xf32> -> vector<32x16xf32>
    %cst_33 = arith.constant dense<0.000000e+00> : vector<1x16xf32>
    %40 = tpu.matmul %38, %39, %cst_33 {dimension_numbers = #tpu.dot_dimension_numbers<[1], [0], [0], [1], [0, 0, 1, 1], [], []>} : vector<1x32xf32>, vector<32x16xf32>, vector<1x16xf32> -> vector<1x16xf32>
    %41 = tpu.transpose %25, [1, 0] : vector<16x32xf32> -> vector<32x16xf32>
    %cst_34 = arith.constant dense<0.000000e+00> : vector<1x16xf32>
    %42 = tpu.matmul %38, %41, %cst_34 {dimension_numbers = #tpu.dot_dimension_numbers<[1], [0], [0], [1], [0, 0, 1, 1], [], []>} : vector<1x32xf32>, vector<32x16xf32>, vector<1x16xf32> -> vector<1x16xf32>
    %43 = tpu.concatenate %40, %42 in 1 : vector<1x16xf32>, vector<1x16xf32> -> vector<1x32xf32>
    %44 = vector.broadcast %0 : f32 to vector<1x32xf32>
    %45 = arith.addf %43, %44 : vector<1x32xf32>
    %c0_35 = arith.constant 0 : index
    %c0_36 = arith.constant 0 : index
    %c0_37 = arith.constant 0 : index
    %46 = vector.load %arg10[%c0_35, %c0_36, %c0_37] : memref<2x1x32xf32, #tpu.memory_space<vmem>>, vector<1x1x32xf32>
    %47 = vector.shape_cast %46 : vector<1x1x32xf32> to vector<1x32xf32>
    %48 = vector.shape_cast %45 : vector<1x32xf32> to vector<1x1x32xf32>
    tpu.vector_store %arg10[%c0_35, %c0_36, %c0_37], %48 {strides = array<i32>} : memref<2x1x32xf32, #tpu.memory_space<vmem>>, vector<1x1x32xf32>,
    %c1 = arith.constant 1 : index
    %c0_38 = arith.constant 0 : index
    %c0_39 = arith.constant 0 : index
    %49 = vector.load %arg0[%c1, %c0_38, %c0_39] : memref<2x16x40xf32, #tpu.memory_space<vmem>>, vector<1x16x40xf32>
    %50 = vector.shape_cast %49 : vector<1x16x40xf32> to vector<16x40xf32>
    %c1_40 = arith.constant 1 : index
    %c0_41 = arith.constant 0 : index
    %c0_42 = arith.constant 0 : index
    %51 = vector.load %arg1[%c1_40, %c0_41, %c0_42] : memref<2x16x40xf32, #tpu.memory_space<vmem>>, vector<1x16x40xf32>
    %52 = vector.shape_cast %51 : vector<1x16x40xf32> to vector<16x40xf32>
    %c1_43 = arith.constant 1 : index
    %c0_44 = arith.constant 0 : index
    %c0_45 = arith.constant 0 : index
    %53 = vector.load %arg2[%c1_43, %c0_44, %c0_45] : memref<2x16x16xf32, #tpu.memory_space<vmem>>, vector<1x16x16xf32>
    %54 = vector.shape_cast %53 : vector<1x16x16xf32> to vector<16x16xf32>
    %c1_46 = arith.constant 1 : index
    %c0_47 = arith.constant 0 : index
    %c0_48 = arith.constant 0 : index
    %55 = vector.load %arg3[%c1_46, %c0_47, %c0_48] : memref<2x40x32xf32, #tpu.memory_space<vmem>>, vector<1x40x32xf32>
    %56 = vector.shape_cast %55 : vector<1x40x32xf32> to vector<40x32xf32>
    %c1_49 = arith.constant 1 : index
    %c0_50 = arith.constant 0 : index
    %c0_51 = arith.constant 0 : index
    %57 = vector.load %arg4[%c1_49, %c0_50, %c0_51] : memref<2x1x32xf32, #tpu.memory_space<vmem>>, vector<1x1x32xf32>
    %58 = vector.shape_cast %57 : vector<1x1x32xf32> to vector<1x32xf32>
    %cst_52 = arith.constant dense<0.000000e+00> : vector<16x32xf32>
    %59 = tpu.matmul %50, %56, %cst_52 {dimension_numbers = #tpu.dot_dimension_numbers<[1], [0], [0], [1], [0, 0, 1, 1], [], []>} : vector<16x40xf32>, vector<40x32xf32>, vector<16x32xf32> -> vector<16x32xf32>
    %cst_53 = arith.constant dense<0.000000e+00> : vector<16x32xf32>
    %60 = tpu.matmul %54, %59, %cst_53 {dimension_numbers = #tpu.dot_dimension_numbers<[1], [0], [0], [1], [0, 0, 1, 1], [], []>} : vector<16x16xf32>, vector<16x32xf32>, vector<16x32xf32> -> vector<16x32xf32>
    %61 = vector.broadcast %58 : vector<1x32xf32> to vector<16x32xf32>
    %62 = arith.addf %60, %61 : vector<16x32xf32>
    %cst_54 = arith.constant 0.000000e+00 : f32
    %63 = vector.broadcast %cst_54 : f32 to vector<16x32xf32>
    %64 = arith.maximumf %62, %63 : vector<16x32xf32>
    %cst_55 = arith.constant dense<0.000000e+00> : vector<16x32xf32>
    %65 = tpu.matmul %52, %56, %cst_55 {dimension_numbers = #tpu.dot_dimension_numbers<[1], [0], [0], [1], [0, 0, 1, 1], [], []>} : vector<16x40xf32>, vector<40x32xf32>, vector<16x32xf32> -> vector<16x32xf32>
    %cst_56 = arith.constant dense<0.000000e+00> : vector<16x32xf32>
    %66 = tpu.matmul %54, %65, %cst_56 {dimension_numbers = #tpu.dot_dimension_numbers<[1], [0], [0], [1], [0, 0, 1, 1], [], []>} : vector<16x16xf32>, vector<16x32xf32>, vector<16x32xf32> -> vector<16x32xf32>
    %67 = vector.broadcast %58 : vector<1x32xf32> to vector<16x32xf32>
    %68 = arith.addf %66, %67 : vector<16x32xf32>
    %cst_57 = arith.constant 0.000000e+00 : f32
    %69 = vector.broadcast %cst_57 : f32 to vector<16x32xf32>
    %70 = arith.maximumf %68, %69 : vector<16x32xf32>
    %c1_58 = arith.constant 1 : index
    %c0_59 = arith.constant 0 : index
    %c0_60 = arith.constant 0 : index
    %71 = vector.load %arg9[%c1_58, %c0_59, %c0_60] : memref<2x16x32xf32, #tpu.memory_space<vmem>>, vector<1x16x32xf32>
    %72 = vector.shape_cast %71 : vector<1x16x32xf32> to vector<16x32xf32>
    %73 = vector.shape_cast %64 : vector<16x32xf32> to vector<1x16x32xf32>
    tpu.vector_store %arg9[%c1_58, %c0_59, %c0_60], %73 {strides = array<i32>} : memref<2x16x32xf32, #tpu.memory_space<vmem>>, vector<1x16x32xf32>,
    %cst_61 = arith.constant dense<0.000000e+00> : vector<32xf32>
    %74 = vector.multi_reduction <add>, %64, %cst_61 [0] : vector<16x32xf32> to vector<32xf32>
    %75 = vector.shape_cast %74 : vector<32xf32> to vector<1x32xf32>
    %cst_62 = arith.constant 1.600000e+01 : f32
    %76 = vector.broadcast %cst_62 : f32 to vector<1x32xf32>
    %77 = arith.divf %75, %76 : vector<1x32xf32>
    %78 = arith.negf %77 : vector<1x32xf32>
    %79 = math.exp %78 : vector<1x32xf32>
    %cst_63 = arith.constant 1.000000e+00 : f32
    %80 = vector.broadcast %cst_63 : f32 to vector<1x32xf32>
    %81 = arith.addf %80, %79 : vector<1x32xf32>
    %82 = arith.divf %80, %81 : vector<1x32xf32>
    %cst_64 = arith.constant dense<0.000000e+00> : vector<1x32xf32>
    %83 = tpu.matmul %82, %1, %cst_64 {dimension_numbers = #tpu.dot_dimension_numbers<[1], [0], [0], [1], [0, 0, 1, 1], [], []>} : vector<1x32xf32>, vector<32x32xf32>, vector<1x32xf32> -> vector<1x32xf32>
    %84 = tpu.transpose %64, [1, 0] : vector<16x32xf32> -> vector<32x16xf32>
    %cst_65 = arith.constant dense<0.000000e+00> : vector<1x16xf32>
    %85 = tpu.matmul %83, %84, %cst_65 {dimension_numbers = #tpu.dot_dimension_numbers<[1], [0], [0], [1], [0, 0, 1, 1], [], []>} : vector<1x32xf32>, vector<32x16xf32>, vector<1x16xf32> -> vector<1x16xf32>
    %86 = tpu.transpose %70, [1, 0] : vector<16x32xf32> -> vector<32x16xf32>
    %cst_66 = arith.constant dense<0.000000e+00> : vector<1x16xf32>
    %87 = tpu.matmul %83, %86, %cst_66 {dimension_numbers = #tpu.dot_dimension_numbers<[1], [0], [0], [1], [0, 0, 1, 1], [], []>} : vector<1x32xf32>, vector<32x16xf32>, vector<1x16xf32> -> vector<1x16xf32>
    %88 = tpu.concatenate %85, %87 in 1 : vector<1x16xf32>, vector<1x16xf32> -> vector<1x32xf32>
    %89 = vector.broadcast %0 : f32 to vector<1x32xf32>
    %90 = arith.addf %88, %89 : vector<1x32xf32>
    %c1_67 = arith.constant 1 : index
    %c0_68 = arith.constant 0 : index
    %c0_69 = arith.constant 0 : index
    %91 = vector.load %arg10[%c1_67, %c0_68, %c0_69] : memref<2x1x32xf32, #tpu.memory_space<vmem>>, vector<1x1x32xf32>
    %92 = vector.shape_cast %91 : vector<1x1x32xf32> to vector<1x32xf32>
    %93 = vector.shape_cast %90 : vector<1x32xf32> to vector<1x1x32xf32>
    tpu.vector_store %arg10[%c1_67, %c0_68, %c0_69], %93 {strides = array<i32>} : memref<2x1x32xf32, #tpu.memory_space<vmem>>, vector<1x1x32xf32>,
    %cst_70 = arith.constant 0.000000e+00 : f32
    %94 = vector.broadcast %cst_70 : f32 to vector<16x32xf32>
    %95 = arith.addf %94, %19 : vector<16x32xf32>
    %96 = arith.addf %95, %64 : vector<16x32xf32>
    %cst_71 = arith.constant 5.000000e-01 : f32
    %97 = vector.broadcast %cst_71 : f32 to vector<16x32xf32>
    %98 = arith.mulf %96, %97 : vector<16x32xf32>
    %cst_72 = arith.constant 0.000000e+00 : f32
    %99 = vector.broadcast %cst_72 : f32 to vector<16x32xf32>
    %100 = arith.addf %99, %25 : vector<16x32xf32>
    %101 = arith.addf %100, %70 : vector<16x32xf32>
    %cst_73 = arith.constant 5.000000e-01 : f32
    %102 = vector.broadcast %cst_73 : f32 to vector<16x32xf32>
    %103 = arith.mulf %101, %102 : vector<16x32xf32>
    %104 = arith.subf %2, %98 : vector<16x32xf32>
    %105 = arith.mulf %104, %104 : vector<16x32xf32>
    %106 = vector.shape_cast %105 : vector<16x32xf32> to vector<1x16x32xf32>
    %cst_74 = arith.constant dense<0.000000e+00> : vector<1xf32>
    %107 = vector.multi_reduction <add>, %106, %cst_74 [1, 2] : vector<1x16x32xf32> to vector<1xf32>
    %108 = vector.shape_cast %107 : vector<1xf32> to vector<1x1x1xf32>
    %109 = vector.extract %108[0, 0, 0] : f32 from vector<1x1x1xf32>
    %110 = vector.broadcast %109 : f32 to vector<1x1xf32>
    %111 = arith.subf %2, %103 : vector<16x32xf32>
    %112 = arith.mulf %111, %111 : vector<16x32xf32>
    %113 = vector.shape_cast %112 : vector<16x32xf32> to vector<1x16x32xf32>
    %cst_75 = arith.constant dense<0.000000e+00> : vector<1xf32>
    %114 = vector.multi_reduction <add>, %113, %cst_75 [1, 2] : vector<1x16x32xf32> to vector<1xf32>
    %115 = vector.shape_cast %114 : vector<1xf32> to vector<1x1x1xf32>
    %116 = vector.extract %115[0, 0, 0] : f32 from vector<1x1x1xf32>
    %117 = vector.broadcast %116 : f32 to vector<1x1xf32>
    %118 = arith.subf %110, %117 : vector<1x1xf32>
    %c0_76 = arith.constant 0 : index
    %c0_77 = arith.constant 0 : index
    %119 = vector.load %arg12[%c0_76, %c0_77] : memref<1x1xf32, #tpu.memory_space<vmem>>, vector<1x1xf32>
    tpu.vector_store %arg12[%c0_76, %c0_77], %118 {strides = array<i32>} : memref<1x1xf32, #tpu.memory_space<vmem>>, vector<1x1xf32>,
    %120 = tpu.concatenate %2, %19, %64 in 0 : vector<16x32xf32>, vector<16x32xf32>, vector<16x32xf32> -> vector<48x32xf32>
    %cst_78 = arith.constant dense<0.000000e+00> : vector<48x4xf32>
    %121 = tpu.matmul %120, %3, %cst_78 {dimension_numbers = #tpu.dot_dimension_numbers<[1], [0], [0], [1], [0, 0, 1, 1], [], []>} : vector<48x32xf32>, vector<32x4xf32>, vector<48x4xf32> -> vector<48x4xf32>
    %122 = arith.mulf %120, %120 : vector<48x32xf32>
    %cst_79 = arith.constant dense<0.000000e+00> : vector<48xf32>
    %123 = vector.multi_reduction <add>, %122, %cst_79 [1] : vector<48x32xf32> to vector<48xf32>
    %124 = vector.shape_cast %123 : vector<48xf32> to vector<48x1xf32>
    %125 = arith.mulf %3, %3 : vector<32x4xf32>
    %cst_80 = arith.constant dense<0.000000e+00> : vector<4xf32>
    %126 = vector.multi_reduction <add>, %125, %cst_80 [0] : vector<32x4xf32> to vector<4xf32>
    %127 = vector.shape_cast %126 : vector<4xf32> to vector<1x4xf32>
    %cst_81 = arith.constant 2.000000e+00 : f32
    %128 = vector.broadcast %cst_81 : f32 to vector<48x4xf32>
    %129 = arith.mulf %128, %121 : vector<48x4xf32>
    %130 = vector.broadcast %124 : vector<48x1xf32> to vector<48x4xf32>
    %131 = arith.subf %130, %129 : vector<48x4xf32>
    %132 = vector.broadcast %127 : vector<1x4xf32> to vector<48x4xf32>
    %133 = arith.addf %131, %132 : vector<48x4xf32>
    %cst_82 = arith.constant 0.000000e+00 : f32
    %134 = vector.broadcast %cst_82 : f32 to vector<48x4xf32>
    %135 = arith.maximumf %133, %134 : vector<48x4xf32>
    %cst_83 = arith.constant 1.000000e+00 : f32
    %136 = vector.broadcast %cst_83 : f32 to vector<48x4xf32>
    %137 = arith.addf %136, %135 : vector<48x4xf32>
    %cst_84 = arith.constant 1.000000e+00 : f32
    %138 = vector.broadcast %cst_84 : f32 to vector<48x4xf32>
    %139 = arith.divf %138, %137 : vector<48x4xf32>
    %cst_85 = arith.constant dense<0.000000e+00> : vector<48xf32>
    %140 = vector.multi_reduction <add>, %139, %cst_85 [1] : vector<48x4xf32> to vector<48xf32>
    %141 = vector.shape_cast %140 : vector<48xf32> to vector<48x1xf32>
    %142 = tpu.reciprocal %141 {approx = true} : vector<48x1xf32> -> vector<48x1xf32>
    %143 = vector.broadcast %142 : vector<48x1xf32> to vector<48x4xf32>
    %144 = arith.mulf %139, %143 : vector<48x4xf32>
    %c0_86 = arith.constant 0 : index
    %c0_87 = arith.constant 0 : index
    %145 = vector.load %arg11[%c0_86, %c0_87] : memref<48x4xf32, #tpu.memory_space<vmem>>, vector<48x4xf32>
    tpu.vector_store %arg11[%c0_86, %c0_87], %144 {strides = array<i32>} : memref<48x4xf32, #tpu.memory_space<vmem>>, vector<48x4xf32>,
    return
  }
}

</mosaic_0001>

<bundles_post_ra>
// kernel: tpu_custom_call.1
= control target key start
LH: loop header
LB: loop body
LE: loop exit
PB: predicated region body
PF: predicated region fallthrough
CT: control target
= control target key end

     0   :  { %19 = vsyncpa [#allocation4], 0  ;;  %vm62_vm0 = vcmask 326656   ;;  %s2390_s0 = inlined_call_operand.vmem [shape: f32[2,16,40], index: 0, kind: input, shape index: {}]   ;;  %s2391_s1 = inlined_call_operand.vmem [shape: f32[2,16,40], index: 1, kind: input, shape index: {}]   ;;  %s2392_s2 = inlined_call_operand.vmem [shape: f32[2,16,16], index: 2, kind: input, shape index: {}]   ;;  %s2393_s3 = inlined_call_operand.vmem [shape: f32[2,40,32], index: 3, kind: input, shape index: {}]   ;;  %s2394_s4 = inlined_call_operand.vmem [shape: f32[2,1,32], index: 4, kind: input, shape index: {}]   ;;  %s2395_s5 = inlined_call_operand.vmem [shape: f32[32,32], index: 5, kind: input, shape index: {}]   ;;  %s2396_s6 = inlined_call_operand.<no memory space> [shape: f32[1], index: 6, kind: input, shape index: {}]   ;;  %s2397_s7 = inlined_call_operand.vmem [shape: f32[16,32], index: 7, kind: input, shape index: {}]   ;;  %s2398_s8 = inlined_call_operand.vmem [shape: f32[32,4], index: 8, kind: input, shape index: {}]   ;;  %s2399_s9 = inlined_call_operand.hbm [shape: f32[2,16,32], index: 9, kind: output, shape index: {0}]   ;;  %s2400_s10 = inlined_call_operand.hbm [shape: f32[2,1,32], index: 10, kind: output, shape index: {1}]   ;;  %s2401_s11 = inlined_call_operand.vmem [shape: f32[48,4], index: 11, kind: output, shape index: {2}]   ;;  %s2402_s12 = inlined_call_operand.hbm [shape: f32[1,1], index: 12, kind: output, shape index: {3}]  }
   0x1   :  { %v60_v0 = vld [vmem:[%s2393_s3 + $0x20] sm:$0xff]  ;;  %v59_v1 = vld [vmem:[%s2393_s3 + $0x18] sm:$0xff]  ;;  %v58_v3 = vld [vmem:[%s2393_s3 + $0x10] sm:$0xff] }
   0x2   :  { %1696 = vmatprep.subr.mxu0 %v60_v0  ;;  %v50_v2 = vld [vmem:[%s2390_s0] sm:$0xff]  ;;  %1716 = vmatprep.subr.mxu1 %v60_v0 }
   0x3   :  { %1697 = vmatpush3.msra.mxu0 %v60_v0  ;;  %1706 = vmatprep.mubr.msk.f32.mxu0 %vm62_vm0, %v50_v2 }
   0x4   :  { %20 = vsyncpa [#allocation6], 0  ;;  %1698 = vmatprep.subr.mxu0 %v59_v1  ;;  %1717 = vmatpush3.msra.mxu1 %v60_v0  ;;  %v57_v4 = vld [vmem:[%s2393_s3 + $0x8] sm:$0xff]  ;;  %v56_v5 = vld [vmem:[%s2393_s3] sm:$0xff]  ;;  %vm150_vm1 = vcmask 130048   ;;  %v1952_v13 = vmov 0.0  }
   0x5   :  { %1699 = vmatpush3.msra.mxu0 %v59_v1  ;;  %1718 = vmatprep.subr.mxu1 %v59_v1  ;;  %v51_v6 = vld [vmem:[%s2390_s0 + $0x8] sm:$0xff]  ;;  %v54_v7 = vld [vmem:[%s2392_s2] sm:$0xff]  ;;  %v2070_v16 = vld [vmem:[%s2395_s5 + $0x18] sm:$0xff]  ;;  %vm1953_vm2 = vmmov 0   ;;  %vm392_vm3 = vcmask 261120   ;;  %vm1296_vm4 = vcmask 0  }
   0x6   :  { %1700 = vmatprep.subr.mxu0 %v58_v3  ;;  %1719 = vmatpush3.msra.mxu1 %v59_v1  ;;  %v52_v8 = vld [vmem:[%s2391_s1] sm:$0xff]  ;;  %v53_v9 = vld [vmem:[%s2391_s1 + $0x8] sm:$0xff]  ;;  %v2079_v17 = vld [vmem:[%s2395_s5 + $0x10] sm:$0xff]  ;;  %vm1427_vm5 = vcmask 31744   ;;  %s1955_s29 = smov [#allocation3]  }
   0x7   :  { %1701 = vmatpush3.msra.mxu0 %v58_v3  ;;  %1720 = vmatprep.subr.mxu1 %v58_v3  ;;  %v55_v12 = vld [vmem:[%s2392_s2 + $0x8] sm:$0xff]  ;;  %v2095_v19 = vld [vmem:[%s2395_s5] sm:$0xff]  ;;  %v1585_v52 = vld [vmem:[%s2390_s0 + $0x10] sm:$0xff]  ;;  %s1524_s30 = sshll.u32 %s1955_s29, 4  ;;  %s1525_s30 = int_to_ptr.vmem [resolvable:$true] %s1524_s30 }
   0x8   :  { %1702 = vmatprep.subr.mxu0 %v57_v4  ;;  %1721 = vmatpush3.msra.mxu1 %v58_v3  ;;  %v2088_v18 = vld [vmem:[%s2395_s5 + $0x8] sm:$0xff]  ;;  %v1570_v20 = vld [vmem:[%s2394_s4] ss:$0 sm:$0xff]  ;;  %v1593_v56 = vld [vmem:[%s2393_s3 + $0x38] sm:$0xff]  ;;  %s1888_s13 = scalar_lea.vmem %s1525_s30, 512  ;;  %p1893_p1 = scmp.lt.s32.totalorder %s1525_s30, %s1525_s30 }
   0x9   :  { %1703 = vmatpush3.msra.mxu0 %v57_v4  ;;  %1722 = vmatprep.subr.mxu1 %v57_v4  ;;  %v1595_v51 = vld [vmem:[%s2393_s3 + $0x48] sm:$0xff]  ;;  %v1594_v54 = vld [vmem:[%s2393_s3 + $0x40] sm:$0xff]  ;;  %v1592_v57 = vld [vmem:[%s2393_s3 + $0x30] sm:$0xff]  ;;  %p1889_p0 = scmp.ne.s32.totalorder %s1525_s30, %s1888_s13  ;;  %p1894_p2 = scmp.lt.s32.totalorder %s1888_s13, %s1888_s13 }
   0xa   :  { %1704 = vmatprep.subr.mxu0 %v56_v5  ;;  %1723 = vmatpush3.msra.mxu1 %v57_v4  ;;  %v1591_v58 = vld [vmem:[%s2393_s3 + $0x28] sm:$0xff]  ;;  %v1586_v59 = vld [vmem:[%s2390_s0 + $0x18] sm:$0xff]  ;;  %v1587_v60 = vld [vmem:[%s2391_s1 + $0x10] sm:$0xff] }
   0xb   :  { %1705 = vmatpush3.msra.mxu0 %v56_v5  ;;  %1724 = vmatprep.subr.mxu1 %v56_v5  ;;  %v1588_v61 = vld [vmem:[%s2391_s1 + $0x18] sm:$0xff]  ;;  %v1589_v62 = vld [vmem:[%s2392_s2 + $0x10] sm:$0xff]  ;;  %p1895_p3 = por %p1894_p2, %p1893_p1 }
   0xc   :  { %1707 = vmatmul.mubr.msk.f32.vlgmr.msra.gmra.mxu0 %vm62_vm0, %v51_v6  ;;  %1725 = vmatpush3.msra.mxu1 %v56_v5  ;;  %v1590_v5 = vld [vmem:[%s2392_s2 + $0x18] sm:$0xff] }
   0xd   :  { %1713 = vmatprep.mubr.msk.f32.mxu0 %vm150_vm1, %v54_v7  ;;  %1726 = vmatprep.mubr.msk.f32.mxu1 %vm62_vm0, %v52_v8  ;;  %v2207_v8 = vld [vmem:[%s2397_s7] sm:$0xff]  ;;  %p1896_p4 = pnand %p1895_p3, %p1889_p0 }
   0xe   :  { %1727 = vmatmul.mubr.msk.f32.vlgmr.msra.gmra.mxu1 %vm62_vm0, %v53_v9  ;;  %1747 = vmatprep.subr.mxu1 %v1952_v13  ;;  %v1399_v9 = vmul.f32 %v2207_v8, %v2207_v8 }
   0xf   :  { %1751 = vmatprep.mubr.msk.f32.mxu1 %vm1953_vm2, %v1952_v13 }
  0xcc   :  { %v1708_v10 = vpop.f32.mrf.mxu0 }
  0xcd   :  { %1709 = vmatprep.subr.mxu0 %v1708_v10 }
  0xce   :  { %v135_v11 = vpop.f32.mrf.mxu0  ;;  %1710 = vmatpush3.msra.mxu0 %v1708_v10  ;;  %v1728_v14 = vpop.f32.mrf.mxu1  ;;  %v1405_v10 = vsel %vm392_vm3, %v1399_v9, 0.0  ;;  %v49_v9 = vld [vmem:[%s2398_s8 + $0x18] sm:$0xff] }
  0xcf   :  { %1711 = vmatprep.subr.mxu0 %v135_v11  ;;  %1406 = vadd.xlane.f32.xlu0 %v1405_v10 }
  0xd0   :  { %1712 = vmatpush3.msra.mxu0 %v135_v11  ;;  %v306_v15 = vpop.f32.mrf.mxu1  ;;  %v2215_v11 = vld [vmem:[%s2397_s7 + $0x8] sm:$0xff] }
  0xd1   :  { %1714 = vmatmul.mubr.msk.f32.vlgmr.msra.gmra.mxu0 %vm150_vm1, %v55_v12  ;;  %1729 = vmatprep.subr.mxu0 %v1728_v14 }
  0xd2   :  { %1733 = vmatprep.mubr.msk.f32.mxu0 %vm150_vm1, %v54_v7  ;;  %1730 = vmatpush3.msra.mxu0 %v1728_v14 }
  0xd3   :  { %1731 = vmatprep.subr.mxu0 %v306_v15 }
  0xd4   :  { %1732 = vmatpush3.msra.mxu0 %v306_v15  ;;  %v1599_v15 = vld [vmem:[%s2394_s4 + $0x1] ss:$0 sm:$0xff] }
  0xd5   :  { %1734 = vmatmul.mubr.msk.f32.vlgmr.msra.gmra.mxu0 %vm150_vm1, %v55_v12  ;;  %1736 = vmatprep.subr.mxu0 %v1952_v13  ;;  %v1400_v12 = vmul.f32 %v2215_v11, %v2215_v11 }
  0xd6   :  { %1737 = vmatpush3.msra.mxu0 %v2070_v16  ;;  %1744 = vmatprep.mubr.msk.f32.mxu0 %vm1953_vm2, %v1952_v13 }
  0xd7   :  { %1738 = vmatprep.subr.mxu0 %v1952_v13  ;;  %v1408_v14 = vsel %vm392_vm3, %v1400_v12, 0.0 }
  0xd8   :  { %1739 = vmatpush3.msra.mxu0 %v2079_v17  ;;  %1409 = vadd.xlane.f32.xlu0 %v1408_v14 }
  0xd9   :  { %1740 = vmatprep.subr.mxu0 %v1952_v13 }
  0xda   :  { %1741 = vmatpush3.msra.mxu0 %v2088_v18 }
  0xdb   :  { %1742 = vmatprep.subr.mxu0 %v1952_v13 }
  0xdc   :  { %1743 = vmatpush3.msra.mxu0 %v2095_v19 }
  0xdd   :  { %1754 = vmatprep.subr.mxu0 %v1952_v13 }
 0x158   :  { %v2271_v10 = vpop.xlane.xlu0 %1406 }
 0x161   :  { %v2273_v12 = vpop.xlane.xlu0 %1409 }
 0x191   :  { %v1715_v21 = vpop.f32.mrf.mxu0 }
 0x192   :  { %v229_v22 = vadd.f32 %v1715_v21, %v1570_v20 }
 0x193   :  { %v223_v23 = vpop.f32.mrf.mxu0 }
 0x194   :  { %v2104_v24 = vmax.f32 %v229_v22, 0.0  ;;  %v224_v25 = vadd.f32 %v1570_v20, %v223_v23 }
 0x195   :  { %v1735_v45 = vpop.f32.mrf.mxu0 }
 0x196   :  { %394 = vst.msk [vmem:[#allocation3 + $0x8] sm:$0xff] %vm392_vm3, %v2104_v24  ;;  %v2108_v26 = vmax.f32 %v224_v25, 0.0  ;;  %1748 = vmatpush3.xpose.msk.msra.mxu1 %vm392_vm3, %v2104_v24  ;;  %v1402_v27 = vmul.f32 %v2104_v24, %v2104_v24  ;;  %v396_v28 = vsel %vm392_vm3, %v2104_v24, 0.0  ;;  %v2130_v46 = vadd.f32 %v1735_v45, %v1570_v20 }
 0x197   :  { %1749 = vmatprep.subr.mxu1 %v1952_v13  ;;  %v381_v47 = vpop.f32.mrf.mxu0 }
 0x198   :  { %v395_v29 = vsel %vm392_vm3, %v2108_v26, 0.0  ;;  %393 = vst.msk [vmem:[#allocation3] sm:$0xff] %vm392_vm3, %v2108_v26  ;;  %v1414_v30 = vsel %vm392_vm3, %v1402_v27, 0.0  ;;  %v1401_v31 = vmul.f32 %v2108_v26, %v2108_v26  ;;  %v391_v48 = vmax.f32 %v2130_v46, 0.0 }
 0x199   :  { %v397_v32 = vadd.f32 %v396_v28, %v395_v29  ;;  %1415 = vadd.xlane.f32.xlu1 %v1414_v30  ;;  %v2133_v49 = vadd.f32 %v1570_v20, %v381_v47 }
 0x19a   :  { %1750 = vmatpush3.xpose.msk.msra.mxu1 %vm392_vm3, %v2108_v26  ;;  %v1411_v34 = vsel %vm392_vm3, %v1401_v31, 0.0 }
 0x19b   :  { %v398_v33 = vrot.slane %v397_v32, 4  ;;  %v390_v50 = vmax.f32 %v2133_v49, 0.0  ;;  %1761 = vmatprep.subr.mxu1 %v1595_v51 }
 0x19d   :  { %v399_v35 = vadd.f32 %v398_v33, %v397_v32  ;;  %1412 = vadd.xlane.f32.xlu1 %v1411_v34 }
 0x19f   :  { %v400_v36 = vrot.slane %v399_v35, 2 }
 0x1a1   :  { %v401_v37 = vadd.f32 %v400_v36, %v399_v35 }
 0x1a3   :  { %v402_v38 = vrot.slane %v401_v37, 1 }
 0x1a5   :  { %v403_v39 = vadd.f32 %v402_v38, %v401_v37 }
 0x1a7   :  { %v1577_v40 = vmul.f32 -0.0625, %v403_v39 }
 0x1a9   :  { %v407_v41 = vmul.f32 1.442695, %v1577_v40 }
 0x1ab   :  { %1856 = vpow2.f32 %v407_v41 }
 0x1b8   :  { %v1857_v42 = vpop.eup %1856 }
 0x1b9   :  { %v409_v43 = vadd.f32 1.0, %v1857_v42 }
 0x1bb   :  { %1858 = vrcp.f32 %v409_v43 }
 0x1c8   :  { %v1859_v44 = vpop.eup %1858 }
 0x1c9   :  { %1745 = vmatmul.mubr.msk.f32.vlgmr.msra.gmra.mxu0 %vm392_vm3, %v1859_v44 }
 0x1ca   :  { %1758 = vmatprep.mubr.msk.f32.mxu0 %vm1953_vm2, %v1952_v13  ;;  %1755 = vmatpush3.xpose.msk.msra.mxu0 %vm392_vm3, %v391_v48 }
 0x1cb   :  { %1756 = vmatprep.subr.mxu0 %v1952_v13 }
 0x1ce   :  { %1757 = vmatpush3.xpose.msk.msra.mxu0 %vm392_vm3, %v390_v50 }
 0x222   :  { %v2275_v14 = vpop.xlane.xlu1 %1415 }
 0x289   :  { %v481_v53 = vpop.f32.mrf.mxu0 }
 0x28a   :  { %1752 = vmatmul.mubr.msk.f32.vlgmr.msra.gmra.mxu1 %vm392_vm3, %v481_v53  ;;  %1759 = vmatmul.mubr.msk.f32.vlgmr.msra.gmra.mxu0 %vm392_vm3, %v481_v53 }
 0x28b   :  { %1762 = vmatpush3.msra.mxu1 %v1595_v51  ;;  %v1746_v55 = vpop.f32.mrf.mxu0  ;;  %1771 = vmatprep.mubr.msk.f32.mxu1 %vm62_vm0, %v1585_v52 }
 0x28c   :  { %1763 = vmatprep.subr.mxu1 %v1594_v54  ;;  %1778 = vmatprep.mubr.msk.f32.mxu0 %vm150_vm1, %v1589_v62 }
 0x28d   :  { %1764 = vmatpush3.msra.mxu1 %v1594_v54 }
 0x28e   :  { %1765 = vmatprep.subr.mxu1 %v1593_v56 }
 0x28f   :  { %1766 = vmatpush3.msra.mxu1 %v1593_v56 }
 0x290   :  { %1767 = vmatprep.subr.mxu1 %v1592_v57 }
 0x291   :  { %1768 = vmatpush3.msra.mxu1 %v1592_v57 }
 0x292   :  { %1769 = vmatprep.subr.mxu1 %v1591_v58 }
 0x293   :  { %1770 = vmatpush3.msra.mxu1 %v1591_v58 }
 0x294   :  { %1772 = vmatmul.mubr.msk.f32.vlgmr.msra.gmra.mxu1 %vm62_vm0, %v1586_v59  ;;  %1781 = vmatprep.subr.mxu1 %v1595_v51 }
 0x295   :  { %1782 = vmatpush3.msra.mxu1 %v1595_v51  ;;  %1791 = vmatprep.mubr.msk.f32.mxu1 %vm62_vm0, %v1587_v60 }
 0x296   :  { %1783 = vmatprep.subr.mxu1 %v1594_v54 }
 0x297   :  { %1784 = vmatpush3.msra.mxu1 %v1594_v54 }
 0x298   :  { %1785 = vmatprep.subr.mxu1 %v1593_v56 }
 0x299   :  { %1786 = vmatpush3.msra.mxu1 %v1593_v56 }
 0x29a   :  { %1787 = vmatprep.subr.mxu1 %v1592_v57 }
 0x29b   :  { %1788 = vmatpush3.msra.mxu1 %v1592_v57 }
 0x29c   :  { %1789 = vmatprep.subr.mxu1 %v1591_v58 }
 0x29d   :  { %1790 = vmatpush3.msra.mxu1 %v1591_v58 }
 0x29e   :  { %1792 = vmatmul.mubr.msk.f32.vlgmr.msra.gmra.mxu1 %vm62_vm0, %v1588_v61  ;;  %1812 = vmatprep.subr.mxu1 %v1952_v13 }
 0x29f   :  { %1816 = vmatprep.mubr.msk.f32.mxu1 %vm1953_vm2, %v1952_v13 }
 0x34a   :  { %v2183_v63 = vpop.f32.mrf.mxu1  ;;  %v2185_v0 = vpop.f32.mrf.mxu0 }
 0x34c   :  { %v1753_v1 = vpop.f32.mrf.mxu1  ;;  %v1760_v2 = vpop.f32.mrf.mxu0 }
 0x354   :  { %v1773_v3 = vpop.f32.mrf.mxu1 }
 0x355   :  { %1774 = vmatprep.subr.mxu0 %v1773_v3 }
 0x356   :  { %v738_v4 = vpop.f32.mrf.mxu1  ;;  %1775 = vmatpush3.msra.mxu0 %v1773_v3 }
 0x357   :  { %1776 = vmatprep.subr.mxu0 %v738_v4 }
 0x358   :  { %1777 = vmatpush3.msra.mxu0 %v738_v4 }
 0x359   :  { %1779 = vmatmul.mubr.msk.f32.vlgmr.msra.gmra.mxu0 %vm150_vm1, %v1590_v5 }
 0x35a   :  { %1798 = vmatprep.mubr.msk.f32.mxu0 %vm150_vm1, %v1589_v62 }
 0x35e   :  { %v1793_v6 = vpop.f32.mrf.mxu1 }
 0x35f   :  { %1794 = vmatprep.subr.mxu0 %v1793_v6 }
 0x360   :  { %v908_v7 = vpop.f32.mrf.mxu1  ;;  %1795 = vmatpush3.msra.mxu0 %v1793_v6 }
 0x361   :  { %1796 = vmatprep.subr.mxu0 %v908_v7 }
 0x362   :  { %1797 = vmatpush3.msra.mxu0 %v908_v7 }
 0x363   :  { %1799 = vmatmul.mubr.msk.f32.vlgmr.msra.gmra.mxu0 %vm150_vm1, %v1590_v5  ;;  %1801 = vmatprep.subr.mxu0 %v1952_v13 }
 0x364   :  { %1802 = vmatpush3.msra.mxu0 %v2070_v16  ;;  %1809 = vmatprep.mubr.msk.f32.mxu0 %vm1953_vm2, %v1952_v13 }
 0x365   :  { %1803 = vmatprep.subr.mxu0 %v1952_v13 }
 0x366   :  { %1804 = vmatpush3.msra.mxu0 %v2079_v17 }
 0x367   :  { %1805 = vmatprep.subr.mxu0 %v1952_v13 }
 0x368   :  { %1806 = vmatpush3.msra.mxu0 %v2088_v18 }
 0x369   :  { %1807 = vmatprep.subr.mxu0 %v1952_v13 }
 0x36a   :  { %1808 = vmatpush3.msra.mxu0 %v2095_v19 }
 0x36b   :  { %1819 = vmatprep.subr.mxu0 %v1952_v13 }
 0x419   :  { %v1780_v16 = vpop.f32.mrf.mxu0 }
 0x41a   :  { %v831_v17 = vadd.f32 %v1780_v16, %v1599_v15 }
 0x41b   :  { %v825_v18 = vpop.f32.mrf.mxu0 }
 0x41c   :  { %v2223_v19 = vmax.f32 %v831_v17, 0.0  ;;  %v826_v20 = vadd.f32 %v1599_v15, %v825_v18  ;;  %v2279_v18 = vpop.xlane.xlu1 %1412 }
 0x41e   :  { %996 = vst.msk [vmem:[#allocation3 + $0x18] sm:$0xff] %vm392_vm3, %v2223_v19  ;;  %v2227_v21 = vmax.f32 %v826_v20, 0.0  ;;  %1813 = vmatpush3.xpose.msk.msra.mxu1 %vm392_vm3, %v2223_v19  ;;  %v1404_v22 = vmul.f32 %v2223_v19, %v2223_v19  ;;  %v1252_v23 = vadd.f32 %v2223_v19, %v2104_v24  ;;  %v998_v25 = vsel %vm392_vm3, %v2223_v19, 0.0 }
 0x41f   :  { %1814 = vmatprep.subr.mxu1 %v1952_v13 }
 0x420   :  { %v997_v27 = vsel %vm392_vm3, %v2227_v21, 0.0  ;;  %995 = vst.msk [vmem:[#allocation3 + $0x10] sm:$0xff] %vm392_vm3, %v2227_v21  ;;  %v1420_v28 = vsel %vm392_vm3, %v1404_v22, 0.0  ;;  %v1403_v29 = vmul.f32 %v2227_v21, %v2227_v21  ;;  %v1251_v30 = vadd.f32 %v2227_v21, %v2108_v26 }
 0x421   :  { %v999_v31 = vadd.f32 %v998_v25, %v997_v27  ;;  %1421 = vadd.xlane.f32.xlu1 %v1420_v28  ;;  %v1254_v32 = vmul.f32 0.5, %v1252_v23 }
 0x422   :  { %1815 = vmatpush3.xpose.msk.msra.mxu1 %vm392_vm3, %v2227_v21  ;;  %v1417_v33 = vsel %vm392_vm3, %v1403_v29, 0.0  ;;  %v1253_v34 = vmul.f32 0.5, %v1251_v30 }
 0x423   :  { %v1000_v35 = vrot.slane %v999_v31, 4  ;;  %v1800_v36 = vpop.f32.mrf.mxu0  ;;  %1418 = vadd.xlane.f32.xlu0 %v1417_v33  ;;  %v1262_v37 = vsub.f32 %v2215_v11, %v1254_v32  ;;  %1826 = vmatprep.subr.mxu1 %v49_v9 }
 0x424   :  { %v989_v38 = vadd.f32 %v1800_v36, %v1599_v15  ;;  %v1261_v39 = vsub.f32 %v2207_v8, %v1253_v34 }
 0x425   :  { %v1001_v40 = vadd.f32 %v1000_v35, %v999_v31  ;;  %v983_v41 = vpop.f32.mrf.mxu0  ;;  %v1264_v42 = vmul.f32 %v1262_v37, %v1262_v37 }
 0x426   :  { %v993_v43 = vmax.f32 %v989_v38, 0.0  ;;  %v984_v44 = vadd.f32 %v1599_v15, %v983_v41  ;;  %v1263_v45 = vmul.f32 %v1261_v39, %v1261_v39  ;;  %v48_v39 = vld [vmem:[%s2398_s8 + $0x10] sm:$0xff]  ;;  %v47_v41 = vld [vmem:[%s2398_s8 + $0x8] sm:$0xff] }
 0x427   :  { %v1002_v47 = vrot.slane %v1001_v40, 2  ;;  %v1266_v54 = vsel %vm392_vm3, %v1264_v42, 0.0  ;;  %v46_v42 = vld [vmem:[%s2398_s8] sm:$0xff]  ;;  %s1954_s8 = smov 16  }
 0x428   :  { %v1258_v51 = vadd.f32 %v993_v43, %v391_v48  ;;  %v992_v52 = vmax.f32 %v984_v44, 0.0  ;;  %v1265_v53 = vsel %vm392_vm3, %v1263_v45, 0.0  ;;  %v1425_v44 = vmul.f32 %v48_v39, %v48_v39 }
 0x429   :  { %v1003_v55 = vadd.f32 %v1002_v47, %v1001_v40  ;;  %v1267_v56 = vadd.f32 %v1266_v54, %v1265_v53 }
 0x42a   :  { %v1260_v57 = vmul.f32 0.5, %v1258_v51  ;;  %v1257_v58 = vadd.f32 %v992_v52, %v390_v50  ;;  %v1426_v51 = vmul.f32 %v49_v9, %v49_v9 }
 0x42b   :  { %v1004_v59 = vrot.slane %v1003_v55, 1  ;;  %1268 = vadd.xlane.f32.xlu0 %v1267_v56 }
 0x42c   :  { %v1259_v60 = vmul.f32 0.5, %v1257_v58  ;;  %v1279_v61 = vsub.f32 %v2215_v11, %v1260_v57 }
 0x42d   :  { %v1005_v62 = vadd.f32 %v1004_v59, %v1003_v55 }
 0x42e   :  { %v1278_v46 = vsub.f32 %v2207_v8, %v1259_v60  ;;  %v1281_v48 = vmul.f32 %v1279_v61, %v1279_v61 }
 0x42f   :  { %v1606_v1 = vmul.f32 -0.0625, %v1005_v62 }
 0x430   :  { %v1280_v2 = vmul.f32 %v1278_v46, %v1278_v46  ;;  %v1283_v5 = vsel %vm392_vm3, %v1281_v48, 0.0 }
 0x431   :  { %v1008_v3 = vmul.f32 1.442695, %v1606_v1 }
 0x432   :  { %v1282_v4 = vsel %vm392_vm3, %v1280_v2, 0.0 }
 0x433   :  { %1860 = vpow2.f32 %v1008_v3  ;;  %v1284_v6 = vadd.f32 %v1283_v5, %v1282_v4 }
 0x435   :  { %1285 = vadd.xlane.f32.xlu1 %v1284_v6 }
 0x440   :  { %v1861_v49 = vpop.eup %1860 }
 0x441   :  { %v1010_v50 = vadd.f32 1.0, %v1861_v49 }
 0x443   :  { %1862 = vrcp.f32 %v1010_v50 }
 0x450   :  { %v1863_v7 = vpop.eup %1862 }
 0x451   :  { %1810 = vmatmul.mubr.msk.f32.vlgmr.msra.gmra.mxu0 %vm392_vm3, %v1863_v7 }
 0x452   :  { %1820 = vmatpush3.xpose.msk.msra.mxu0 %vm392_vm3, %v993_v43  ;;  %1823 = vmatprep.mubr.msk.f32.mxu0 %vm1953_vm2, %v1952_v13  ;;  %v1423_v43 = vmul.f32 %v46_v42, %v46_v42 }
 0x453   :  { %1821 = vmatprep.subr.mxu0 %v1952_v13 }
 0x456   :  { %1822 = vmatpush3.xpose.msk.msra.mxu0 %vm392_vm3, %v992_v52 }
 0x4aa   :  { %v2281_v22 = vpop.xlane.xlu1 %1421 }
 0x4ac   :  { %v2277_v15 = vpop.xlane.xlu0 %1418 }
 0x4b4   :  { %v1269_v16 = vpop.xlane.xlu0 %1268 }
 0x4b5   :  { %v1270_v17 = vrot.slane %v1269_v16, 4 }
 0x4b7   :  { %v1271_v13 = vadd.f32 %v1270_v17, %v1269_v16 }
 0x4b9   :  { %v1272_v20 = vrot.slane %v1271_v13, 2 }
 0x4bb   :  { %v1273_v23 = vadd.f32 %v1272_v20, %v1271_v13 }
 0x4bd   :  { %v1274_v25 = vrot.slane %v1273_v23, 1 }
 0x4be   :  { %v1286_v27 = vpop.xlane.xlu1 %1285 }
 0x4bf   :  { %v1287_v28 = vrot.slane %v1286_v27, 4  ;;  %v1275_v29 = vadd.f32 %v1274_v25, %v1273_v23 }
 0x4c1   :  { %v1288_v30 = vadd.f32 %v1287_v28, %v1286_v27  ;;  %1843 = vpush %v1275_v29 }
 0x4c3   :  { %v1289_v31 = vrot.slane %v1288_v30, 2 }
 0x4c5   :  { %v1290_v32 = vadd.f32 %v1289_v31, %v1288_v30 }
 0x4c7   :  { %v1291_v33 = vrot.slane %v1290_v32, 1 }
 0x4c9   :  { %v1292_v34 = vadd.f32 %v1291_v33, %v1290_v32 }
 0x4cb   :  { %1845 = vpush %v1292_v34 }
 0x4f2   :  { %s1844_s21 = spop %1843 }
 0x4f3   :  { %v1277_v35 = vstv %s1844_s21 }
 0x4fc   :  { %s1846_s22 = spop %1845 }
 0x4fd   :  { %v1294_v36 = vstv %s1846_s22 }
 0x4fe   :  { %v1295_v37 = vsub.f32 %v1277_v35, %v1294_v36 }
 0x500   :  { %1297 = vst.msk [vmem:[#allocation7] sm:$0x1] %vm1296_vm4, %v1295_v37 }
 0x511   :  { %v1082_v38 = vpop.f32.mrf.mxu0 }
 0x512   :  { %1817 = vmatmul.mubr.msk.f32.vlgmr.msra.gmra.mxu1 %vm392_vm3, %v1082_v38  ;;  %1824 = vmatmul.mubr.msk.f32.vlgmr.msra.gmra.mxu0 %vm392_vm3, %v1082_v38 }
 0x513   :  { %1827 = vmatpush3.msra.mxu1 %v49_v9  ;;  %v1811_v40 = vpop.f32.mrf.mxu0  ;;  %1834 = vmatprep.mubr.msk.f32.mxu1 %vm392_vm3, %v2207_v8  ;;  %v1424_v8 = vmul.f32 %v47_v41, %v47_v41 }
 0x514   :  { %1828 = vmatprep.subr.mxu1 %v48_v39 }
 0x515   :  { %1829 = vmatpush3.msra.mxu1 %v48_v39  ;;  %v1429_v45 = vsel %vm1427_vm5, %v1424_v8, 0.0 }
 0x516   :  { %1830 = vmatprep.subr.mxu1 %v47_v41 }
 0x517   :  { %1831 = vmatpush3.msra.mxu1 %v47_v41 }
 0x518   :  { %1832 = vmatprep.subr.mxu1 %v46_v42 }
 0x519   :  { %1833 = vmatpush3.msra.mxu1 %v46_v42 }
 0x51a   :  { %1835 = vmatmul.mubr.msk.f32.vlgmr.msra.gmra.mxu1 %vm392_vm3, %v2215_v11  ;;  %v1428_v11 = vsel %vm1427_vm5, %v1423_v43, 0.0 }
 0x51b   :  { %1837 = vmatprep.mubr.msk.f32.mxu1 %vm392_vm3, %v2108_v26  ;;  %v1430_v47 = vadd.f32 %v1429_v45, %v1428_v11  ;;  %v1431_v26 = vsel %vm1427_vm5, %v1425_v44, 0.0 }
 0x51d   :  { %v1432_v52 = vadd.f32 %v1431_v26, %v1430_v47 }
 0x51e   :  { %1838 = vmatmul.mubr.msk.f32.gmra.mxu1 %vm392_vm3, %v2104_v24  ;;  %v1433_v24 = vsel %vm1427_vm5, %v1426_v51, 0.0 }
 0x51f   :  { %1840 = vmatprep.mubr.msk.f32.mxu1 %vm392_vm3, %v2227_v21  ;;  %v1434_v53 = vadd.f32 %v1433_v24, %v1432_v52 }
 0x521   :  { %v1435_v21 = vrot.slane %v1434_v53, 4 }
 0x522   :  { %1841 = vmatmul.mubr.msk.f32.gmra.mxu1 %vm392_vm3, %v2223_v19 }
 0x523   :  { %v1436_v54 = vadd.f32 %v1435_v21, %v1434_v53 }
 0x525   :  { %v1437_v55 = vrot.slane %v1436_v54, 2 }
 0x527   :  { %v1438_v57 = vadd.f32 %v1437_v55, %v1436_v54 }
 0x529   :  { %v1439_v60 = vrot.slane %v1438_v57, 1 }
 0x52b   :  { %v1440_v62 = vadd.f32 %v1439_v60, %v1438_v57 }
 0x5d2   :  { %v2310_v19 = vpop.f32.mrf.mxu1  ;;  %v2312_v56 = vpop.f32.mrf.mxu0 }
 0x5d4   :  { %v1818_v58 = vpop.f32.mrf.mxu1  ;;  %v1825_v59 = vpop.f32.mrf.mxu0 }
 0x5da   :  { %v1836_v61 = vpop.f32.mrf.mxu1 }
 0x5db   :  { %v1442_v46 = vmul.f32 2.0, %v1836_v61 }
 0x5dc   :  { %v1370_v48 = vpop.f32.mrf.mxu1 }
 0x5dd   :  { %v1448_v1 = vsub.f32 %v2273_v12, %v1442_v46  ;;  %v1441_v2 = vmul.f32 2.0, %v1370_v48 }
 0x5de   :  { %v1839_v3 = vpop.f32.mrf.mxu1 }
 0x5df   :  { %v1454_v4 = vadd.f32 %v1448_v1, %v1440_v62  ;;  %v1447_v5 = vsub.f32 %v2271_v10, %v1441_v2  ;;  %v1444_v6 = vmul.f32 2.0, %v1839_v3 }
 0x5e0   :  { %v1380_v49 = vpop.f32.mrf.mxu1 }
 0x5e1   :  { %v1460_v50 = vmax.f32 %v1454_v4, 0.0  ;;  %v1453_v7 = vadd.f32 %v1447_v5, %v1440_v62  ;;  %v1450_v9 = vsub.f32 %v2275_v14, %v1444_v6  ;;  %v1443_v16 = vmul.f32 2.0, %v1380_v49 }
 0x5e2   :  { %v1842_v17 = vpop.f32.mrf.mxu1 }
 0x5e3   :  { %v1466_v13 = vadd.f32 1.0, %v1460_v50  ;;  %v1459_v20 = vmax.f32 %v1453_v7, 0.0  ;;  %v1456_v23 = vadd.f32 %v1450_v9, %v1440_v62  ;;  %v1449_v25 = vsub.f32 %v2279_v18, %v1443_v16 }
 0x5e4   :  { %v1446_v27 = vmul.f32 2.0, %v1842_v17  ;;  %v1390_v12 = vpop.f32.mrf.mxu1 }
 0x5e5   :  { %1864 = vrcp.f32 %v1466_v13  ;;  %v1465_v28 = vadd.f32 1.0, %v1459_v20  ;;  %v1462_v29 = vmax.f32 %v1456_v23, 0.0  ;;  %v1455_v30 = vadd.f32 %v1449_v25, %v1440_v62 }
 0x5e6   :  { %v1452_v10 = vsub.f32 %v2281_v22, %v1446_v27  ;;  %v1445_v31 = vmul.f32 2.0, %v1390_v12 }
 0x5e7   :  { %1866 = vrcp.f32 %v1465_v28  ;;  %v1468_v32 = vadd.f32 1.0, %v1462_v29  ;;  %v1461_v33 = vmax.f32 %v1455_v30, 0.0 }
 0x5e8   :  { %v1458_v14 = vadd.f32 %v1452_v10, %v1440_v62  ;;  %v1451_v34 = vsub.f32 %v2277_v15, %v1445_v31 }
 0x5e9   :  { %1868 = vrcp.f32 %v1468_v32  ;;  %v1467_v35 = vadd.f32 1.0, %v1461_v33 }
 0x5ea   :  { %v1464_v36 = vmax.f32 %v1458_v14, 0.0  ;;  %v1457_v37 = vadd.f32 %v1451_v34, %v1440_v62 }
 0x5eb   :  { %1870 = vrcp.f32 %v1467_v35 }
 0x5ec   :  { %v1470_v18 = vadd.f32 1.0, %v1464_v36  ;;  %v1463_v38 = vmax.f32 %v1457_v37, 0.0 }
 0x5ee   :  { %1872 = vrcp.f32 %v1470_v18  ;;  %v1469_v39 = vadd.f32 1.0, %v1463_v38 }
 0x5f0   :  { %1874 = vrcp.f32 %v1469_v39 }
 0x5f2   :  { %v1865_v40 = vpop.eup %1864 }
 0x5f3   :  { %v1486_v22 = vsel %vm1427_vm5, %v1865_v40, 0.0 }
 0x5f4   :  { %v1867_v41 = vpop.eup %1866  ;;  %1487 = vadd.xlane.f32.xlu1 %v1486_v22 }
 0x5f5   :  { %v1483_v42 = vsel %vm1427_vm5, %v1867_v41, 0.0 }
 0x5f6   :  { %v2322_v8 = vpop.eup %1868  ;;  %1484 = vadd.xlane.f32.xlu0 %v1483_v42 }
 0x5f7   :  { %v1492_v15 = vsel %vm1427_vm5, %v2322_v8, 0.0 }
 0x5f8   :  { %v2326_v43 = vpop.eup %1870  ;;  %1493 = vadd.xlane.f32.xlu1 %v1492_v15 }
 0x5f9   :  { %v1489_v44 = vsel %vm1427_vm5, %v2326_v43, 0.0 }
 0x5fa   :  { %1490 = vadd.xlane.f32.xlu0 %v1489_v44 }
 0x5fb   :  { %v2330_v45 = vpop.eup %1872 }
 0x5fc   :  { %v1498_v11 = vsel %vm1427_vm5, %v2330_v45, 0.0 }
 0x5fd   :  { %v2334_v47 = vpop.eup %1874  ;;  %1499 = vadd.xlane.f32.xlu1 %v1498_v11 }
 0x5fe   :  { %v1495_v51 = vsel %vm1427_vm5, %v2334_v47, 0.0 }
 0x5ff   :  { %1496 = vadd.xlane.f32.xlu0 %v1495_v51 }
 0x60e   :  { %1242 = vrot.lane.b32.xlu1 %v2312_v56, %s1954_s8 }
 0x615   :  { %641 = vrot.lane.b32.xlu0 %v2185_v0, %s1954_s8 }
 0x616   :  { %1899 = shalt.err (!%p1896_p4)
}
 0x617   :  { %s1956_s3 = smov 128   ;;  %s1957_s0 = smov 8   ;;  %v645_v54 = vstv %s2396_s6  ;;  %vm647_vm6 = vcmask 253952  }
 0x618   :  { %1530 = dma.vmem_to_hbm [thread:$0]  %s1525_s30, 512, %s2399_s9, [#allocation4], %s1956_s3, %s1956_s3, %s1957_s0  }
 0x619   :  { %s1958_s9 = smov [#allocation5]   ;;  %s1959_s5 = smov [#allocation7]  }
 0x61a   :  { %s1536_s2 = sshll.u32 %s1958_s9, 4  ;;  %s1551_s17 = sshll.u32 %s1959_s5, 4  ;;  %s1537_s2 = int_to_ptr.vmem [resolvable:$true] %s1536_s2  ;;  %s1552_s17 = int_to_ptr.vmem [resolvable:$true] %s1551_s17 }
 0x61b   :  { %s1908_s4 = scalar_lea.vmem %s1537_s2, 32  ;;  %p1913_p6 = scmp.lt.s32.totalorder %s1537_s2, %s1537_s2 }
 0x61c   :  { %p1909_p5 = scmp.ne.s32.totalorder %s1537_s2, %s1908_s4  ;;  %p1914_p7 = scmp.lt.s32.totalorder %s1908_s4, %s1908_s4 }
 0x61e   :  { %p1915_p8 = por %p1914_p7, %p1913_p6 }
 0x620   :  { %p1916_p9 = pnand %p1915_p8, %p1909_p5 }
 0x67d   :  { %v1488_v26 = vpop.xlane.xlu1 %1487 }
 0x67e   :  { %1876 = vrcp.f32 %v1488_v26 }
 0x67f   :  { %v1485_v52 = vpop.xlane.xlu0 %1484 }
 0x680   :  { %1878 = vrcp.f32 %v1485_v52 }
 0x681   :  { %v1494_v0 = vpop.xlane.xlu1 %1493 }
 0x682   :  { %1880 = vrcp.f32 %v1494_v0 }
 0x683   :  { %v1491_v24 = vpop.xlane.xlu0 %1490 }
 0x684   :  { %1882 = vrcp.f32 %v1491_v24 }
 0x686   :  { %v1500_v53 = vpop.xlane.xlu1 %1499 }
 0x687   :  { %1884 = vrcp.f32 %v1500_v53 }
 0x688   :  { %v1497_v21 = vpop.xlane.xlu0 %1496 }
 0x689   :  { %1886 = vrcp.f32 %v1497_v21 }
 0x68a   :  { %v1243_v55 = vpop.permute.xlu1 %1242 }
 0x68b   :  { %v1877_v56 = vpop.eup %1876  ;;  %v1245_v57 = vsel %vm150_vm1, %v2310_v19, %v1243_v55 }
 0x68c   :  { %v1508_v58 = vmul.f32 %v1877_v56, %v1865_v40  ;;  %v1246_v59 = vadd.f32 %v1245_v57, %v645_v54  ;;  %v642_v60 = vpop.permute.xlu0 %641 }
 0x68d   :  { %v1879_v61 = vpop.eup %1878  ;;  %v644_v62 = vsel %vm150_vm1, %v2183_v63, %v642_v60 }
 0x68e   :  { %1514 = vst.msk [vmem:[%s2401_s11 + $0x8] sm:$0xff] %vm1427_vm5, %v1508_v58  ;;  %v1507_v46 = vmul.f32 %v1879_v61, %v1867_v41  ;;  %v646_v19 = vadd.f32 %v645_v54, %v644_v62 }
 0x68f   :  { %1248 = vst.msk [vmem:[#allocation5 + $0x1] sm:$0x1] %vm647_vm6, %v1246_v59  ;;  %v1881_v48 = vpop.eup %1880 }
 0x690   :  { %1513 = vst.msk [vmem:[%s2401_s11] sm:$0xff] %vm1427_vm5, %v1507_v46  ;;  %v1510_v1 = vmul.f32 %v1881_v48, %v2322_v8 }
 0x691   :  { %648 = vst.msk [vmem:[#allocation5] sm:$0x1] %vm647_vm6, %v646_v19  ;;  %v1883_v63 = vpop.eup %1882 }
 0x692   :  { %1919 = shalt.err (!%p1916_p9)
}
 0x693   :  { %s1960_s7 = smov 1   ;;  %1516 = vst.msk [vmem:[%s2401_s11 + $0x18] sm:$0xff] %vm1427_vm5, %v1510_v1  ;;  %v1509_v2 = vmul.f32 %v1883_v63, %v2326_v43  ;;  %s1928_s25 = scalar_lea.vmem %s1552_s17, 16 }
 0x694   :  { %1542 = dma.vmem_to_hbm [thread:$0]  %s1537_s2, 32, %s2400_s10, [#allocation6], %s1954_s8, %s1954_s8, %s1960_s7  }
 0x695   :  { %p1929_p10 = scmp.ne.s32.totalorder %s1552_s17, %s1928_s25  ;;  %s1932_s26 = scalar_lea.vmem %s1552_s17, 32 }
 0x696   :  { %p1933_p11 = scmp.lt.s32.totalorder %s1552_s17, %s1552_s17  ;;  %p1934_p12 = scmp.lt.s32.totalorder %s1932_s26, %s1928_s25 }
 0x698   :  { %p1935_p13 = por %p1934_p12, %p1933_p11 }
 0x69a   :  { %p1936_p0 = pnand %p1935_p13, %p1929_p10 }
 0x69c   :  { %1939 = shalt.err (!%p1936_p0)
}
 0x69d   :  { %1554 = dma.vmem_to_hbm [thread:$0]  %s1552_s17, 16, %s2402_s12, [#allocation6]   ;;  %v1885_v3 = vpop.eup %1884  ;;  %1515 = vst.msk [vmem:[%s2401_s11 + $0x10] sm:$0xff] %vm1427_vm5, %v1509_v2 }
 0x69e   :  { %v1512_v4 = vmul.f32 %v1885_v3, %v2330_v45  ;;  %v1887_v5 = vpop.eup %1886 }
 0x69f   :  { %v1511_v6 = vmul.f32 %v1887_v5, %v2334_v47 }
 0x6a0   :  { %1518 = vst.msk [vmem:[%s2401_s11 + $0x28] sm:$0xff] %vm1427_vm5, %v1512_v4 }
 0x6a1   :  { %1517 = vst.msk [vmem:[%s2401_s11 + $0x20] sm:$0xff] %vm1427_vm5, %v1511_v6 }
 0x6a2   :  { %1948 = dma.done.wait [#allocation4], 512  }
 0x6a3   :  { %1949 = vsyncadd [#allocation4], 4294966784 }
 0x6a4   :  { %1950 = dma.done.wait [#allocation6], 48  }
 0x6a5   :  { %1951 = vsyncadd [#allocation6], 4294967248 }
 0x6a6   :  { %1566 = vsyncpa [#allocation4], 1 }
 0x6a7   :  { %1567 = vsyncpa [#allocation6], 1 }

</bundles_post_ra>
